<compile_context>
chip_gen: v7x
topology: tpu7x:2x2x1
jax: 0.10.0
libtpu: 0.0.40
codegen_flags: <defaults>
</compile_context>

<pallas_src>
import math
import jax
import jax.numpy as jnp
from jax.experimental import pallas as pl
from jax.experimental.pallas import tpu as pltpu


def _round_up(x, m):
    return (x + m - 1) // m * m


# ------------------------------------------------------------------ kernels --

def rgcn_kernel(adj_ref, xw_ref, xi_ref, invdeg_ref, root_ref, bias_ref, out_ref):
    # grid = (row tiles i [parallel], relations r, col tiles k); (r, k) are reduction axes.
    r = pl.program_id(1)
    k = pl.program_id(2)

    @pl.when((r == 0) & (k == 0))
    def _():
        # Self-loop epilogue folded into the accumulator init so it overlaps the adj
        # prefetch:  out = x_i @ root + bias + x_i   (self-loop transform + bias + residual)
        xi = xi_ref[...]
        out_ref[...] = (jnp.dot(xi, root_ref[...],
                                preferred_element_type=jnp.float32)
                        + bias_ref[...]
                        + xi.astype(jnp.float32))

    # Partial neighbor aggregation with the associativity refactor:
    #   adj_counts[r, i-tile, k-tile] (int8, exact) @ (x @ W_r)[k-tile] (bf16), f32 acc.
    # The exact f32 per-row 1/deg scale distributes over the k-sum, so it is applied to the
    # partial product and accumulated straight into the resident f32 output block.
    a = adj_ref[0].astype(jnp.bfloat16)                       # int8 -> bf16 (VPU, hidden under DMA)
    part = jnp.dot(a, xw_ref[0], preferred_element_type=jnp.float32)
    out_ref[...] += invdeg_ref[0] * part


def _make_attn_kernel(Bt, Lp):
    def attn_kernel(h_ref, madd_ref, a_ref, b_ref, out_ref):
        # h: (Bt*Lp, Hp) f32, madd: (Bt*Lp, 1) additive logit mask (-1e30 on pads/padding).
        h = h_ref[...]
        Hp = h.shape[-1]
        s = jnp.tanh(jnp.dot(h, a_ref[...],
                             preferred_element_type=jnp.float32))        # (Bt*Lp, Dp)
        # (L, da) @ (da, 1) replaced by a VPU multiply + lane reduction (keeps the MXU free).
        e = jnp.sum(s * b_ref[...], axis=-1, keepdims=True)              # (Bt*Lp, 1)
        e = e + madd_ref[...]

        # Per-segment (per batch row) softmax via cheap leading-dim reshapes (lane dim is
        # unchanged and Lp is a multiple of 8, so these are tile-aligned sublane splits).
        e3 = e.reshape(Bt, Lp, 1)
        m3 = jnp.max(e3, axis=1, keepdims=True)                          # per-segment max
        p3 = jnp.exp(e3 - m3)                                            # (Bt, Lp, 1)
        denom = jnp.sum(p3, axis=1)                                      # (Bt, 1)

        p = p3.reshape(Bt * Lp, 1)
        pooled = jnp.sum((p * h).reshape(Bt, Lp, Hp), axis=1)            # (Bt, Hp)
        out_ref[...] = (pooled *
                        pl.reciprocal(denom, approx=True)).astype(out_ref.dtype)
    return attn_kernel


# ----------------------------------------------------------------- wrappers --

def rgcn_layer(adj_cnt, invdeg, x, w, root, bias):
    """adj_cnt: (R, N, N) int32 edge counts, invdeg: (R, N, 1) f32 exact 1/deg,
    x: (N, H), w: (R, H, H), root: (H, H), bias: (H,).
    Returns (Np, Hp) f32 with out[:N, :H] = sum_r (D_r^-1 A_r x) W_r + x @ root + bias + x."""
    R, N, _ = adj_cnt.shape
    H = x.shape[-1]
    Hp = _round_up(H, 128)          # lane-dense hidden dim (TODO(synk): pad to 256 on v6e/v7x
                                    # once the adj stream stops being the roofline)

    if N <= 1024:
        # Small-N: full-extent contraction tile, but >=2 row tiles so the parallel i axis
        # can shard across the two v7x TensorCores.
        Np = _round_up(N, 16)
        tk = Np
        tm = Np // 2
        vmem_limit = None
    else:
        # Large-N: 2048 adj tiles (4 MiB int8, 8 MiB double-buffered) amortize the ~0.35us
        # per-grid-step cost; raise the scoped VMEM limit above the 16/32 MiB defaults.
        tk = 2048
        Np = _round_up(N, tk)
        tm = min(2048, Np // 2)
        vmem_limit = 48 << 20

    n_i, n_k = Np // tm, Np // tk

    # Associativity: (A_r x) W_r == A_r (x W_r).  xw is tiny (R*N*H*H) relative to the
    # adjacency matmul and removes the per-relation MXU epilogue from the kernel.
    xw = jnp.einsum("nh,rho->rno", x, w, precision=jax.lax.Precision.HIGHEST)

    # int8 un-normalized edge counts (exact; half the bf16 HBM stream), bf16 matmul operands
    # for x/xw/root, f32 accumulation and exact f32 1/deg normalization.
    adj_p = jnp.zeros((R, Np, Np), jnp.int8).at[:, :N, :N].set(adj_cnt.astype(jnp.int8))
    xw_p = jnp.zeros((R, Np, Hp), jnp.bfloat16).at[:, :N, :H].set(xw.astype(jnp.bfloat16))
    xi_p = jnp.zeros((Np, Hp), jnp.bfloat16).at[:N, :H].set(x.astype(jnp.bfloat16))
    inv_p = jnp.zeros((R, Np, 1), jnp.float32).at[:, :N].set(invdeg)
    root_p = jnp.zeros((Hp, Hp), jnp.bfloat16).at[:H, :H].set(root.astype(jnp.bfloat16))
    bias_p = jnp.zeros((1, Hp), jnp.float32).at[0, :H].set(bias)

    flops = 2 * R * Np * Np * Hp + 2 * Np * Hp * Hp
    bytes_accessed = (R * Np * Np                       # adj (int8)
                      + 2 * R * Np * Hp * n_i           # xw re-streamed per row tile
                      + 2 * Np * Hp + 2 * Hp * Hp       # x (self-loop), root
                      + 4 * R * Np + 4 * Np * Hp + 4 * Hp)  # 1/deg, out, bias

    return pl.pallas_call(
        rgcn_kernel,
        out_shape=jax.ShapeDtypeStruct((Np, Hp), jnp.float32),
        grid_spec=pltpu.PrefetchScalarGridSpec(
            num_scalar_prefetch=0,
            grid=(n_i, R, n_k),
            in_specs=[
                pl.BlockSpec((1, tm, tk), lambda i, r, k: (r, i, k)),   # adj counts (int8)
                pl.BlockSpec((1, tk, Hp), lambda i, r, k: (r, k, 0)),   # (x @ W_r) rows
                pl.BlockSpec((tm, Hp), lambda i, r, k: (i, 0)),         # x rows (self-loop)
                pl.BlockSpec((1, tm, 1), lambda i, r, k: (r, i, 0)),    # exact 1/deg rows
                pl.BlockSpec((Hp, Hp), lambda i, r, k: (0, 0)),         # root
                pl.BlockSpec((1, Hp), lambda i, r, k: (0, 0)),          # bias
            ],
            out_specs=pl.BlockSpec((tm, Hp), lambda i, r, k: (i, 0)),   # f32 accumulator
        ),
        compiler_params=pltpu.CompilerParams(
            dimension_semantics=("parallel", "arbitrary", "arbitrary"),
            vmem_limit_bytes=vmem_limit),
        cost_estimate=pl.CostEstimate(flops=int(flops), transcendentals=0,
                                      bytes_accessed=int(bytes_accessed)),
    )(adj_p, xw_p, xi_p, inv_p, root_p, bias_p)


def self_attention_seq(h_flat, mask_add, a, b, B, L):
    """h_flat: (B*L, Hp) gathered entity embeddings (hidden zero-padded to Hp),
    mask_add: (B*L, 1) additive logit mask, a: (H, da), b: (da, 1).
    Returns (B, Hp) pooled vectors (columns >= H are zero)."""
    Hp = h_flat.shape[-1]
    H, da = a.shape
    Dp = _round_up(da, 128)
    Lp = _round_up(L, 8)            # sublane-aligned sequence length
    Bt = min(B, 64)                 # up to 64 batch rows per grid step (amortize step cost)
    Bp = _round_up(B, Bt)

    # Padded (Bp, Lp) slab; padded positions / padded batch rows get -1e30 logits and zero
    # features, so they contribute nothing (and the padded denominators never hit 0).
    hf = (jnp.zeros((Bp, Lp, Hp), jnp.float32)
          .at[:B, :L, :].set(h_flat.reshape(B, L, Hp))).reshape(Bp * Lp, Hp)
    ma = (jnp.full((Bp, Lp, 1), -1e30, jnp.float32)
          .at[:B, :L, :].set(mask_add.reshape(B, L, 1))).reshape(Bp * Lp, 1)
    a_p = jnp.zeros((Hp, Dp), jnp.float32).at[:H, :da].set(a)
    b_p = jnp.zeros((1, Dp), jnp.float32).at[0, :da].set(b[:, 0])

    out = pl.pallas_call(
        _make_attn_kernel(Bt, Lp),
        out_shape=jax.ShapeDtypeStruct((Bp, Hp), jnp.float32),
        grid_spec=pltpu.PrefetchScalarGridSpec(
            num_scalar_prefetch=0,
            grid=(Bp // Bt,),
            in_specs=[
                pl.BlockSpec((Bt * Lp, Hp), lambda i: (i, 0)),
                pl.BlockSpec((Bt * Lp, 1), lambda i: (i, 0)),
                pl.BlockSpec((Hp, Dp), lambda i: (0, 0)),
                pl.BlockSpec((1, Dp), lambda i: (0, 0)),
            ],
            out_specs=pl.BlockSpec((Bt, Hp), lambda i: (i, 0)),
        ),
        compiler_params=pltpu.CompilerParams(dimension_semantics=("parallel",)),
    )(hf, ma, a_p, b_p)
    return out[:B]


def rgcn_encoder_forward(params, edge_index, edge_type, entity_ids,
                         n_entity, num_relations, pad_entity_id):
    node_embeds = params["node_embeds"]
    N, H = node_embeds.shape

    # --- glue: dense per-relation edge counts + exact 1/deg (aggr='mean' in RGCNConv).
    # TODO(synk): at production scale (pad_entity_id ~ 31k) replace the dense (R, N, N)
    # adjacency with a blocked-CSR / scalar-prefetch formulation (per-relation row offsets
    # driving the index_map + manual row-gather DMA); dense R*N*N is the roofline there.
    src, dst = edge_index[0], edge_index[1]
    adj_cnt = jnp.zeros((num_relations, N, N), jnp.int32).at[edge_type, dst, src].add(1)
    deg = jnp.sum(adj_cnt, axis=-1, keepdims=True)
    invdeg = 1.0 / jnp.maximum(deg, 1).astype(jnp.float32)

    # --- glue: relation weights from bases:  W_r = sum_b comp[r, b] * basis[b]
    w = jnp.einsum("rb,bio->rio", params["comp"], params["basis"])

    # hot path 1: tiled RGCN conv + root + bias + residual  (Pallas)
    ent = rgcn_layer(adj_cnt, invdeg, node_embeds, w, params["root"], params["bias"])
    ent = ent[:N]                                                       # drop row padding

    # --- glue: gather entity sequences + additive pad mask for the logits.
    # TODO(synk): fuse this gather into attn_kernel (scalar-prefetch entity_ids + manual
    # row-gather DMA from the RGCN output left in HBM) to remove one HBM round trip.
    B, L = entity_ids.shape
    h_flat = ent[entity_ids].reshape(B * L, -1)                         # (B*L, Hp)

    mask = entity_ids == pad_entity_id
    full_mask = -1e30 * mask.astype(jnp.float32)
    batch_mask = (jnp.sum(~mask, axis=-1) > 0).astype(jnp.float32)[:, None]
    mask_add = (full_mask * batch_mask).reshape(B * L, 1)

    # hot path 2: batched self-attention pooling  (Pallas)
    out = self_attention_seq(h_flat, mask_add, params["attn_a"], params["attn_b"], B, L)
    return out[:, :H]


# ---------------------------------------------------------------- reference --

def rgcn_encoder_reference(params, edge_index, edge_type, entity_ids,
                           n_entity, num_relations, pad_entity_id,
                           quantize_like_kernel=False):
    hi = jax.lax.Precision.HIGHEST

    def q(v):
        return v.astype(jnp.bfloat16).astype(jnp.float32) if quantize_like_kernel else v

    x = params["node_embeds"]
    src, dst = edge_index[0], edge_index[1]
    N = x.shape[0]
    adj = jnp.zeros((num_relations, N, N), jnp.float32).at[edge_type, dst, src].add(1.0)
    deg = jnp.sum(adj, axis=-1, keepdims=True)
    invdeg = 1.0 / jnp.maximum(deg, 1.0)
    w = jnp.einsum("rb,bio->rio", params["comp"], params["basis"])

    if quantize_like_kernel:
        # Mirror the kernel math: exact integer adjacency, exact f32 1/deg, bf16 (x @ W_r),
        # bf16 x/root for the self-loop + residual, f32 accumulation everywhere.
        xw = q(jnp.einsum("nh,rho->rno", x, w, precision=hi))
        agg = jnp.einsum("rij,rjh->rih", adj, xw, precision=hi)
        conv = jnp.sum(invdeg * agg, axis=0)
        ent = (conv + jnp.matmul(q(x), q(params["root"]), precision=hi)
               + params["bias"] + q(x))
    else:
        adj_n = adj * invdeg
        agg = jnp.einsum("rij,jh->rih", adj_n, x, precision=hi)
        conv = (jnp.einsum("rih,rho->io", agg, w, precision=hi)
                + jnp.matmul(x, params["root"], precision=hi) + params["bias"])
        ent = conv + x

    h = ent[entity_ids]
    mask = entity_ids == pad_entity_id
    e = jnp.matmul(jnp.tanh(jnp.matmul(h, params["attn_a"], precision=hi)),
                   params["attn_b"], precision=hi)                     # (B, L, 1)
    full_mask = -1e30 * mask.astype(jnp.float32)
    batch_mask = (jnp.sum(~mask, axis=-1) > 0).astype(jnp.float32)[:, None]
    e = e + (full_mask * batch_mask)[..., None]
    attn = jax.nn.softmax(e, axis=1)
    return jnp.sum(attn * h, axis=1)


# --------------------------------------------------------------------- main --

def _xavier(key, shape, gain=1.0):
    fan_in, fan_out = shape[-2], shape[-1]
    bound = gain * math.sqrt(6.0 / (fan_in + fan_out))
    return jax.random.uniform(key, shape, jnp.float32, -bound, bound)


if __name__ == "__main__":
    # small shapes consistent with the module
    hidden = 32          # hidden_size (and da == hidden_size in attn_layer)
    n_entity = 64
    num_relations = 3
    num_bases = 2
    n_edges = 40
    batch, seq = 2, 8
    pad_entity_id = n_entity - 1     # stand-in for 31161 at small scale

    key = jax.random.PRNGKey(0)
    keys = jax.random.split(key, 10)

    stdv = math.sqrt(6.0 / (n_entity + hidden))
    params = {
        "node_embeds": jax.random.uniform(keys[0], (n_entity, hidden),
                                          jnp.float32, -stdv, stdv),
        "basis": _xavier(keys[1], (num_bases, hidden, hidden)),
        "comp": _xavier(keys[2], (num_relations, num_bases)),
        "root": _xavier(keys[3], (hidden, hidden)),
        "bias": jnp.zeros((hidden,), jnp.float32),
        "attn_a": _xavier(keys[4], (hidden, hidden), gain=1.414),
        "attn_b": _xavier(keys[5], (hidden, 1), gain=1.414),
    }

    edge_index = jax.random.randint(keys[6], (2, n_edges), 0, n_entity,
                                    dtype=jnp.int32)
    edge_type = jax.random.randint(keys[7], (n_edges,), 0, num_relations,
                                   dtype=jnp.int32)

    entity_ids = jax.random.randint(keys[8], (batch, seq), 0, n_entity - 1,
                                    dtype=jnp.int32)
    # exercise the pad mask
    entity_ids = entity_ids.at[:, -2:].set(pad_entity_id)

    out = rgcn_encoder_forward(params, edge_index, edge_type, entity_ids,
                               n_entity, num_relations, pad_entity_id)
    out = jax.block_until_ready(out)
    assert out.shape == (batch, hidden)

    # Tight check vs a reference that applies the same bf16 operand quantization
    # (adjacency and 1/deg are exact in the kernel, so only x / xW / root are quantized).
    ref_q = rgcn_encoder_reference(params, edge_index, edge_type, entity_ids,
                                   n_entity, num_relations, pad_entity_id,
                                   quantize_like_kernel=True)
    assert jnp.allclose(out, ref_q, rtol=2e-2, atol=2e-2), "mismatch vs bf16-matched reference"

    # Looser check vs the full-f32 reference (tolerance accounts for the bf16 operand cast
    # on x / xW / root; the adjacency path and normalization are exact, accumulation is f32).
    ref = rgcn_encoder_reference(params, edge_index, edge_type, entity_ids,
                                 n_entity, num_relations, pad_entity_id,
                                 quantize_like_kernel=False)
    assert jnp.allclose(out, ref, rtol=5e-2, atol=5e-2), "mismatch vs f32 reference"

    print("KERNEL_OK")
</pallas_src>

<mosaic_0001>
module attributes {stable_mosaic.version = 11 : i64} {
  func.func @rgcn_kernel(%arg0: i32, %arg1: i32, %arg2: i32, %arg3: memref<1x32x64xi8, #tpu.memory_space<vmem>>, %arg4: memref<1x64x128xbf16, #tpu.memory_space<vmem>>, %arg5: memref<32x128xbf16, #tpu.memory_space<vmem>>, %arg6: memref<1x32x1xf32, #tpu.memory_space<vmem>>, %arg7: memref<128x128xbf16, #tpu.memory_space<vmem>>, %arg8: memref<1x128xf32, #tpu.memory_space<vmem>>, %arg9: memref<32x128xf32, #tpu.memory_space<vmem>>) attributes {dimension_semantics = [#tpu.dimension_semantics<parallel>, #tpu.dimension_semantics<arbitrary>, #tpu.dimension_semantics<arbitrary>], iteration_bounds = array<i64: 2, 3, 1>, scalar_prefetch = 0 : i64, scratch_operands = 0 : i64, tpu.core_type = #tpu.core_type<tc>, window_params = [{transform_indices = @transform_0, window_bounds = array<i64: 1, 32, 64>}, {transform_indices = @transform_1, window_bounds = array<i64: 1, 64, 128>}, {transform_indices = @transform_2, window_bounds = array<i64: 32, 128>}, {transform_indices = @transform_3, window_bounds = array<i64: 1, 32, 1>}, {pipeline_mode = #tpu.pipeline_mode<synchronous>, transform_indices = @transform_4, window_bounds = array<i64: 128, 128>}, {pipeline_mode = #tpu.pipeline_mode<synchronous>, transform_indices = @transform_5, window_bounds = array<i64: 1, 128>}, {transform_indices = @transform_6, window_bounds = array<i64: 32, 128>}]} {
    %c0_i32 = arith.constant 0 : i32
    %0 = arith.cmpi eq, %arg1, %c0_i32 : i32
    %c0_i32_0 = arith.constant 0 : i32
    %1 = arith.cmpi eq, %arg2, %c0_i32_0 : i32
    %2 = arith.andi %0, %1 : i1
    %3 = arith.extui %2 : i1 to i32
    %c0_i32_1 = arith.constant 0 : i32
    %4 = arith.cmpi ne, %3, %c0_i32_1 : i32
    scf.if %4 {
      %c0_14 = arith.constant 0 : index
      %c0_15 = arith.constant 0 : index
      %18 = vector.load %arg5[%c0_14, %c0_15] : memref<32x128xbf16, #tpu.memory_space<vmem>>, vector<32x128xbf16>
      %c0_16 = arith.constant 0 : index
      %c0_17 = arith.constant 0 : index
      %19 = vector.load %arg7[%c0_16, %c0_17] : memref<128x128xbf16, #tpu.memory_space<vmem>>, vector<128x128xbf16>
      %cst_18 = arith.constant dense<0.000000e+00> : vector<32x128xf32>
      %20 = tpu.matmul %18, %19, %cst_18 {dimension_numbers = #tpu.dot_dimension_numbers<[1], [0], [0], [1], [0, 0, 1, 1], [], []>} : vector<32x128xbf16>, vector<128x128xbf16>, vector<32x128xf32> -> vector<32x128xf32>
      %c0_19 = arith.constant 0 : index
      %c0_20 = arith.constant 0 : index
      %21 = vector.load %arg8[%c0_19, %c0_20] : memref<1x128xf32, #tpu.memory_space<vmem>>, vector<1x128xf32>
      %22 = vector.broadcast %21 : vector<1x128xf32> to vector<32x128xf32>
      %23 = arith.addf %20, %22 : vector<32x128xf32>
      %24 = arith.extf %18 : vector<32x128xbf16> to vector<32x128xf32>
      %25 = arith.addf %23, %24 : vector<32x128xf32>
      %c0_21 = arith.constant 0 : index
      %c0_22 = arith.constant 0 : index
      %26 = vector.load %arg9[%c0_21, %c0_22] : memref<32x128xf32, #tpu.memory_space<vmem>>, vector<32x128xf32>
      tpu.vector_store %arg9[%c0_21, %c0_22], %25 {strides = array<i32>} : memref<32x128xf32, #tpu.memory_space<vmem>>, vector<32x128xf32>,
    } else {
    }
    %c0 = arith.constant 0 : index
    %c0_2 = arith.constant 0 : index
    %c0_3 = arith.constant 0 : index
    %5 = vector.load %arg3[%c0, %c0_2, %c0_3] : memref<1x32x64xi8, #tpu.memory_space<vmem>>, vector<1x32x64xi8>
    %6 = vector.shape_cast %5 : vector<1x32x64xi8> to vector<32x64xi8>
    %7 = arith.sitofp %6 : vector<32x64xi8> to vector<32x64xbf16>
    %c0_4 = arith.constant 0 : index
    %c0_5 = arith.constant 0 : index
    %c0_6 = arith.constant 0 : index
    %8 = vector.load %arg4[%c0_4, %c0_5, %c0_6] : memref<1x64x128xbf16, #tpu.memory_space<vmem>>, vector<1x64x128xbf16>
    %9 = vector.shape_cast %8 : vector<1x64x128xbf16> to vector<64x128xbf16>
    %cst = arith.constant dense<0.000000e+00> : vector<32x128xf32>
    %10 = tpu.matmul %7, %9, %cst {dimension_numbers = #tpu.dot_dimension_numbers<[1], [0], [0], [1], [0, 0, 1, 1], [], []>} : vector<32x64xbf16>, vector<64x128xbf16>, vector<32x128xf32> -> vector<32x128xf32>
    %c0_7 = arith.constant 0 : index
    %c0_8 = arith.constant 0 : index
    %11 = vector.load %arg9[%c0_7, %c0_8] : memref<32x128xf32, #tpu.memory_space<vmem>>, vector<32x128xf32>
    %c0_9 = arith.constant 0 : index
    %c0_10 = arith.constant 0 : index
    %c0_11 = arith.constant 0 : index
    %12 = vector.load %arg6[%c0_9, %c0_10, %c0_11] : memref<1x32x1xf32, #tpu.memory_space<vmem>>, vector<1x32x1xf32>
    %13 = vector.shape_cast %12 : vector<1x32x1xf32> to vector<32x1xf32>
    %14 = vector.broadcast %13 : vector<32x1xf32> to vector<32x128xf32>
    %15 = arith.mulf %14, %10 : vector<32x128xf32>
    %16 = arith.addf %11, %15 : vector<32x128xf32>
    %c0_12 = arith.constant 0 : index
    %c0_13 = arith.constant 0 : index
    %17 = vector.load %arg9[%c0_12, %c0_13] : memref<32x128xf32, #tpu.memory_space<vmem>>, vector<32x128xf32>
    tpu.vector_store %arg9[%c0_12, %c0_13], %16 {strides = array<i32>} : memref<32x128xf32, #tpu.memory_space<vmem>>, vector<32x128xf32>,
    return
  }
  func.func @transform_0(%arg0: i32, %arg1: i32, %arg2: i32) -> (i32, i32, i32) {
    %c0_i32 = arith.constant 0 : i32
    return %arg1, %arg0, %arg2 : i32, i32, i32
  }
  func.func @transform_1(%arg0: i32, %arg1: i32, %arg2: i32) -> (i32, i32, i32) {
    %c0_i32 = arith.constant 0 : i32
    %c0_i32_0 = arith.constant 0 : i32
    return %arg1, %arg2, %c0_i32 : i32, i32, i32
  }
  func.func @transform_2(%arg0: i32, %arg1: i32, %arg2: i32) -> (i32, i32) {
    %c0_i32 = arith.constant 0 : i32
    %c0_i32_0 = arith.constant 0 : i32
    return %arg0, %c0_i32 : i32, i32
  }
  func.func @transform_3(%arg0: i32, %arg1: i32, %arg2: i32) -> (i32, i32, i32) {
    %c0_i32 = arith.constant 0 : i32
    %c0_i32_0 = arith.constant 0 : i32
    return %arg1, %arg0, %c0_i32 : i32, i32, i32
  }
  func.func @transform_4(%arg0: i32, %arg1: i32, %arg2: i32) -> (i32, i32) {
    %c0_i32 = arith.constant 0 : i32
    %c0_i32_0 = arith.constant 0 : i32
    %c0_i32_1 = arith.constant 0 : i32
    return %c0_i32, %c0_i32_0 : i32, i32
  }
  func.func @transform_5(%arg0: i32, %arg1: i32, %arg2: i32) -> (i32, i32) {
    %c0_i32 = arith.constant 0 : i32
    %c0_i32_0 = arith.constant 0 : i32
    %c0_i32_1 = arith.constant 0 : i32
    return %c0_i32, %c0_i32_0 : i32, i32
  }
  func.func @transform_6(%arg0: i32, %arg1: i32, %arg2: i32) -> (i32, i32) {
    %c0_i32 = arith.constant 0 : i32
    %c0_i32_0 = arith.constant 0 : i32
    return %arg0, %c0_i32 : i32, i32
  }
}

</mosaic_0001>

<bundles_post_ra>
// kernel: tpu_custom_call.1
= control target key start
LH: loop header
LB: loop body
LE: loop exit
PB: predicated region body
PF: predicated region fallthrough
CT: control target
= control target key end

     0   :  { %s1537_s0 = inlined_call_operand.hbm [shape: s8[3,64,64], index: 0, kind: input, shape index: {}]   ;;  %s1538_s1 = inlined_call_operand.vmem [shape: bf16[3,64,128], index: 1, kind: input, shape index: {}]   ;;  %s1539_s2 = inlined_call_operand.vmem [shape: bf16[64,128], index: 2, kind: input, shape index: {}]   ;;  %s1540_s3 = inlined_call_operand.vmem [shape: f32[3,64,1], index: 3, kind: input, shape index: {}]   ;;  %s1541_s4 = inlined_call_operand.vmem [shape: bf16[128,128], index: 4, kind: input, shape index: {}]   ;;  %s1542_s5 = inlined_call_operand.vmem [shape: f32[1,128], index: 5, kind: input, shape index: {}]   ;;  %s1543_s6 = inlined_call_operand.hbm [shape: f32[64,128], index: 6, kind: output, shape index: {}]  }
   0x1   :  { %1555 = sst [smem:[#allocation16_spill]] %s1537_s0 }
   0x2   :  { %1556 = sst [smem:[#allocation17_spill]] %s1543_s6 }
   0x3   :  { %11 = vsyncpa [#allocation3], 0 }
   0x4   :  { %13 = vsyncpa [#allocation3 + $0x1], 0 }
   0x5   :  { %14 = vsyncpa [#allocation4], 0 }
   0x6   :  { %16 = vsyncpa [#allocation4 + $0x1], 0  ;;  %s1234_s21 = smov 0   ;;  %s1236_s22 = smov 0  }
   0x7   :  { %s1238_s23 = smov 0   ;;  %s1240_s24 = smov 0  }
   0x8   :  { %s1242_s25 = smov 0   ;;  %s1244_s26 = smov 0  }
   0x9   :  { %s1246_s27 = smov 0   ;;  %s1248_s28 = smov 0  }
   0xa   :  { %s1250_s29 = smov 0   ;;  %s1252_s30 = smov 0  }
   0xb   :  { %s1254_s7 = smov 0  }
   0xc LB: > { %1557 = sst [smem:[#allocation8_spill]] %s1168_s25  ;;  %s826_s8 = sadd.s32 4294967295, %s1192_s7   ;;  %s1192_s7 = sphi %s1254_s7, %s22_s7   ;;  %s1188_s30 = sphi %s1252_s30, %s1586_s30   ;;  %s1184_s29 = sphi %s1250_s29, %s1585_s29   ;;  %s1180_s28 = sphi %s1248_s28, %s1584_s28   ;;  %s1176_s27 = sphi %s1246_s27, %s1583_s27   ;;  %s1172_s26 = sphi %s1244_s26, %s1582_s26   ;;  %s1168_s25 = sphi %s1242_s25, %s1581_s25   ;;  %s1164_s24 = sphi %s1240_s24, %s1580_s24   ;;  %s1160_s23 = sphi %s1238_s23, %s1589_s23   ;;  %s1156_s22 = sphi %s1236_s22, %s1588_s22   ;;  %s1152_s21 = sphi %s1234_s21, %s1587_s21  }
   0xd   : > { %1558 = sst [smem:[#allocation9_spill]] %s1172_s26  ;;  %s827_s9 = sadd.s32 4294967294, %s1192_s7  }
   0xe   : > { %1559 = sst [smem:[#allocation10_spill]] %s1184_s29  ;;  %s37_s10 = sadd.s32 1, %s1184_s29 }
   0xf   : > { %1560 = sst [smem:[#allocation11_spill]] %s1188_s30  ;;  %s41_s11 = sadd.s32 1, %s1188_s30 }
  0x10   : > { %p39_p0 = scmp.ge.s32.totalorder %s37_s10, 3  ;;  %s52_s12 = sadd.s32 1, %s1172_s26 }
  0x11   : > { %p59_p1 = scmp.ne.s32.totalorder %s1172_s26, %s1168_s25  ;;  %p60_p2 = scmp.eq.s32.totalorder %s1192_s7, 0 }
  0x12   : > { %s1591_s10 = smov (%p39_p0, %s37_s10), 0  ;;  %s1593_s11 = smov (!%p39_p0, %s41_s11), %s1188_s30 }
  0x13   : > { %1561 = sst [smem:[#allocation12_spill]] %s1591_s10  ;;  %s45_s13 = ssub.s32 %s1184_s29, %s1591_s10 }
  0x14   : > { %p1300_p3 = por %p60_p2, %p59_p1  ;;  %p43_p4 = scmp.ge.s32.totalorder %s1593_s11, 2 }
  0x15   : > { %p65_p5 = scmp.ne.s32.totalorder %s1168_s25, %s1164_s24  ;;  %p66_p6 = scmp.eq.s32.totalorder %s826_s8, 0 }
  0x16   : > { %s202_s15 = sadd.s32 1, %s1160_s23  ;;  %s1595_s11 = smov (%p43_p4, %s1593_s11), 0 }
  0x17   : > { %1563 = sst [smem:[#allocation13_spill]] %s1595_s11  ;;  %p1308_p7 = por %p66_p6, %p65_p5 }
  0x18   : > { %p212_p8 = scmp.ne.s32.totalorder %s1160_s23, %s1156_s22  ;;  %s46_s17 = ssub.s32 %s1188_s30, %s1595_s11 }
  0x19   : > { %p213_p9 = scmp.eq.s32.totalorder %s826_s8, 5  ;;  %s47_s18 = sor.u32 %s46_s17, %s45_s13 }
  0x1a   : > { %p200_p10 = scmp.eq.s32.totalorder %s46_s17, 0  ;;  %p50_p11 = scmp.eq.s32.totalorder %s47_s18, 0 }
  0x1b   : > { %p1316_p12 = por %p213_p9, %p212_p8  ;;  %p218_p13 = scmp.ne.s32.totalorder %s1156_s22, %s1152_s21 }
  0x1c   : > { %s1321_s20 = scalar_select %p200_p10, %s1160_s23, %s202_s15  }
  0x1d   : > { %s1565_s19 = scalar_select %p1316_p12, 1, 0 }
  0x1e   : > { %s1324_s24 = scalar_select %p50_p11, %s1172_s26, %s52_s12  }
  0x1f   : > { %1566 = sst [smem:[#allocation14_spill]] %s1565_s19  ;;  %p219_p0 = scmp.eq.s32.totalorder %s827_s9, 5 }
  0x20   : > { %1567 = sst [smem:[#allocation15_spill]] %s1324_s24  ;;  %p929_p1 = scmp.lt.s32.totalorder %s1192_s7, 6 }
  0x21   : > { %p1329_p2 = por %p219_p0, %p218_p13  ;;  %s245_s8 = sand.u32 1, %s1172_s26  }
  0x22   : > { %s830_s13 = sshll.u32 %s245_s8, 3  ;;  %s831_s17 = sshll.u32 %s1184_s29, 1 }
  0x23   : > { %s1568_s11 = scalar_select %p1329_p2, 1, 0 }
  0x24   : > { %s255_s18 = sadd.s32 %s1188_s30, %s831_s17  ;;  %s249_s10 = scalar_lea.vmem [#allocation2], %s830_s13 }
  0x25   : > { %s259_s6 = sshll.u32 %s249_s10, 4  ;;  %s832_s19 = sshll.u32 %s255_s18, 7  ;;  %s1336_s6 = int_to_ptr.vmem [resolvable:$true] %s259_s6 }
  0x26   : > { %s1569_s0 = sld [smem:[#allocation16_spill]]  ;;  %p1345_p4 = pnand %p929_p1, %p1300_p3 }
  0x27   : > { %s246_s10 = scalar_lea.sflag [#allocation3], %s245_s8 }
  0x28   : > { %p1042_p9 = pneg %p1345_p4 }
  0x2c   : > { %s1341_s24 = scalar_lea.hbm %s1569_s0, %s832_s19  ;;  %s1045_s17 = scalar_lea.hbm %s1569_s0, 768 }
  0x2d   : > { %s1040_s13 = scalar_lea.hbm %s1341_s24, 128  ;;  %p1046_p3 = scmp.lt.u32.totalorder %s1341_s24, %s1569_s0 }
  0x2e   : > { %p1041_p8 = scmp.ne.s32.totalorder %s1341_s24, %s1040_s13  ;;  %p1047_p13 = scmp.lt.u32.totalorder %s1045_s17, %s1040_s13 }
  0x2f   : > { %p1049_p1 = scmp.lt.u32.totalorder %s1040_s13, %s1341_s24 }
  0x30   : > { %p1043_p10 = pnand %p1042_p9, %p1041_p8  ;;  %p1048_p0 = por %p1047_p13, %p1046_p3 }
  0x32   : > { %p1044_p11 = pneg %p1043_p10  ;;  %p1050_p5 = por %p1049_p1, %p1048_p0 }
  0x34   : > { %p1051_p6 = pnand %p1050_p5, %p1044_p11 }
  0x36   : > { %1054 = shalt.err (!%p1051_p6)
}
  0x37   : > { %s1055_s8 = scalar_lea.vmem %s1336_s6, 128  ;;  %s1194_s12 = smov [#allocation2]  }
  0x38   : > { %p1056_p8 = scmp.ne.s32.totalorder %s1336_s6, %s1055_s8  ;;  %s1060_s14 = sshll.u32 %s1194_s12, 4  ;;  %s1061_s14 = int_to_ptr.vmem [resolvable:$false] %s1060_s14 }
  0x39   : > { %s1062_s19 = scalar_lea.vmem %s1061_s14, 256  ;;  %p1063_p12 = scmp.lt.s32.totalorder %s1336_s6, %s1061_s14 }
  0x3a   : > { %p1058_p10 = pnand %p1056_p8, %p1042_p9  ;;  %p1064_p3 = scmp.lt.s32.totalorder %s1062_s19, %s1055_s8 }
  0x3c   : > { %p1059_p2 = pneg %p1058_p10  ;;  %p1065_p13 = por %p1064_p3, %p1063_p12 }
  0x3e   : > { %p1066_p0 = pnand %p1065_p13, %p1059_p2 }
  0x40   : > { %1069 = shalt.err (!%p1066_p0)
}
  0x41   : > { %924 = dma.hbm_to_vmem [thread:$0]  (!%p1345_p4), %s1341_s24, 128, %s1336_s6, %s246_s10  }
  0x42   : > { %p1571_p5 = scmp.lt.s32.totalorder %s1192_s7, 7  ;;  %p1572_p6 = scmp.ge.s32.totalorder %s1192_s7, 1 }
  0x44   : > { %p300_p9 = pnand %p1572_p6, %p1571_p5 }
  0x45   : > { %s305_s13 = sand.u32 (!%p300_p9), 1, %s1168_s25  }
  0x46   : > { %303 = sbr.rel (%p300_p9) target bundleno = 587 (0x24b), region = 44  ;;  %s1381_s17 = sshll.u32 (!%p300_p9), %s305_s13, 3 }
  0x47   : > { %s306_s18 = scalar_lea.sflag (!%p300_p9), [#allocation3], %s305_s13 }
  0x4d   : > { %1143 = dma.done.wait (%p1308_p7), %s306_s18, 128  }
  0x4e   : > { %1145 = vsyncadd (%p1308_p7), %s306_s18, 4294967168  ;;  %s1552_s6 = sand.u32 1, %s1156_s22   ;;  %p362_p12 = scmp.lt.s32.totalorder %s1176_s27, 2 }
  0x4f   : > { %s835_s24 = sshll.u32 %s1552_s6, 5  ;;  %s838_s9 = sshll.u32 %s1180_s28, 2 }
  0x50   : > { %p372_p2 = scmp.lt.s32.totalorder %s838_s9, 7  ;;  %p389_p7 = scmp.eq.s32.totalorder %s1176_s27, 0 }
  0x51   : > { %s363_s10 = scalar_select %p362_p12, %s1176_s27, 2 }
  0x52   : > { %s1597_s9 = smov (!%p372_p2, %s838_s9), 7  ;;  %394 = sbr.rel (!%p389_p7) target bundleno = 336 (0x150), region = 52 }
  0x53   : > { %s866_s8 = sshll.u32 %s363_s10, 5  ;;  %s841_s12 = sshll.u32 %s363_s10, 3  ;;  %v1022_v0 = vld [vmem:[%s1541_s4] sm:$0xff] (%p389_p7)   ;;  %v1023_v1 = vld [vmem:[%s1541_s4 + $0x8] sm:$0xff] (%p389_p7)   ;;  %v1024_v2 = vld [vmem:[%s1541_s4 + $0x10] sm:$0xff] (%p389_p7)  }
  0x54   : > { %s1397_s16 = scalar_lea.vmem %s1538_s1, %s866_s8  ;;  %s839_s13 = sshll.u32 %s1597_s9, 2  ;;  %885 = vmatprep.subr.bf16.mxu0 (%p389_p7), %v1022_v0  ;;  %v1025_v3 = vld [vmem:[%s1541_s4 + $0x18] sm:$0xff] (%p389_p7)   ;;  %v1026_v5 = vld [vmem:[%s1541_s4 + $0x20] sm:$0xff] (%p389_p7)   ;;  %v1027_v6 = vld [vmem:[%s1541_s4 + $0x28] sm:$0xff] (%p389_p7)  }
  0x55   : > { %s1402_s0 = scalar_lea.vmem %s1539_s2, %s839_s13  ;;  %s383_s30 = sadd.s32 %s841_s12, %s1597_s9  ;;  %886 = vmatpush3.bf16.msra.mxu0 (%p389_p7), %v1022_v0  ;;  %v1028_v7 = vld [vmem:[%s1541_s4 + $0x30] sm:$0xff] (%p389_p7)   ;;  %v1029_v8 = vld [vmem:[%s1541_s4 + $0x38] sm:$0xff] (%p389_p7)   ;;  %v844_v10 = vld [vmem:[%s1542_s5] ss:$0 sm:$0xff] (%p389_p7) }
  0x56   : > { %s842_s29 = sshll.u32 %s383_s30, 3  ;;  %s1410_s10 = scalar_lea.vmem [#allocation5], %s835_s24  ;;  %887 = vmatprep.subr.bf16.mxu0 (%p389_p7), %v1023_v1  ;;  %v395_v4 = vld [vmem:[%s1402_s0] sm:$0xff] (%p389_p7)   ;;  %v397_v9 = vld [vmem:[%s1402_s0 + $0x8] sm:$0xff] (%p389_p7)  }
  0x57   : > { %s1408_s25 = scalar_lea.vmem %s1540_s3, %s842_s29  ;;  %901 = vmatprep.mubr.bf16.mxu0 (%p389_p7), %v395_v4  ;;  %v533_v11 = vunpack.c.l.bf16 (%p389_p7), %v397_v9  ;;  %v531_v12 = vunpack.c.l.bf16 (%p389_p7), %v395_v4  ;;  %v534_v16 = vunpack.c.h.bf16 (%p389_p7), %v397_v9  ;;  %v532_v17 = vunpack.c.h.bf16 (%p389_p7), %v395_v4 }
  0x59   : > { %888 = vmatpush3.bf16.msra.mxu0 %v1023_v1 }
  0x5a   : > { %889 = vmatprep.subr.bf16.mxu0 %v1024_v2 }
  0x5d   : > { %890 = vmatpush3.bf16.msra.mxu0 %v1024_v2 }
  0x5e   : > { %891 = vmatprep.subr.bf16.mxu0 %v1025_v3 }
  0x61   : > { %892 = vmatpush3.bf16.msra.mxu0 %v1025_v3 }
  0x62   : > { %893 = vmatprep.subr.bf16.mxu0 %v1026_v5 }
  0x65   : > { %894 = vmatpush3.bf16.msra.mxu0 %v1026_v5 }
  0x66   : > { %895 = vmatprep.subr.bf16.mxu0 %v1027_v6 }
  0x69   : > { %896 = vmatpush3.bf16.msra.mxu0 %v1027_v6 }
  0x6a   : > { %897 = vmatprep.subr.bf16.mxu0 %v1028_v7 }
  0x6d   : > { %898 = vmatpush3.bf16.msra.mxu0 %v1028_v7 }
  0x6e   : > { %899 = vmatprep.subr.bf16.mxu0 %v1029_v8 }
  0x71   : > { %900 = vmatpush3.bf16.msra.mxu0 %v1029_v8 }
  0x74   : > { %902 = vmatmul.mubr.bf16.vlgmr.msra.gmra.mrb[0].mxu0 %v397_v9 }
 0x147   : > { %v903_v13 = vpop.f32.mrb[0].mxu0 }
 0x148   : > { %v525_v14 = vadd.f32 %v903_v13, %v844_v10  ;;  %v516_v15 = vpop.f32.mrb[1].mxu0 }
 0x149   : > { %v517_v18 = vadd.f32 %v844_v10, %v516_v15  ;;  %v904_v19 = vpop.f32.mrb[2].mxu0 }
 0x14a   : > { %v537_v20 = vadd.f32 %v533_v11, %v525_v14  ;;  %v528_v21 = vadd.f32 %v904_v19, %v844_v10  ;;  %v519_v22 = vpop.f32.mrb[3].mxu0 }
 0x14b   : > { %v535_v23 = vadd.f32 %v531_v12, %v517_v18  ;;  %v520_v24 = vadd.f32 %v844_v10, %v519_v22 }
 0x14c   : > { %541 = vst [vmem:[%s1410_s10 + $0x10] sm:$0xff] %v537_v20  ;;  %v538_v25 = vadd.f32 %v534_v16, %v528_v21 }
 0x14d   : > { %539 = vst [vmem:[%s1410_s10] sm:$0xff] %v535_v23  ;;  %v536_v26 = vadd.f32 %v532_v17, %v520_v24 }
 0x14e   : > { %542 = vst [vmem:[%s1410_s10 + $0x18] sm:$0xff] %v538_v25 }
 0x14f   : > { %540 = vst [vmem:[%s1410_s10 + $0x8] sm:$0xff] %v536_v26 }
 0x150 PF: > { %v1036_v27 = vld [vmem:[%s1397_s16] sm:$0xff]   ;;  %v1037_v28 = vld [vmem:[%s1397_s16 + $0x8] sm:$0xff]   ;;  %v1195_v29 = vmov 0   ;;  %v1038_v30 = vld [vmem:[%s1397_s16 + $0x10] sm:$0xff]   ;;  %s1573_s0 = scalar_lea.vmem [#allocation2], %s1381_s17  ;;  %vm578_vm0 = vcmask 523264  }
 0x151   : > { %905 = vmatprep.subr.bf16.mxu0 %v1036_v27  ;;  %1035 = vset.pattern.permute.xlu1 %v1195_v29  ;;  %v543_v31 = vld [vmem:[%s1573_s0] sm:$0xff]  ;;  %v640_v32 = vld [vmem:[%s1408_s25 + $0x10] sm:$0xff]  ;;  %v641_v35 = vld [vmem:[%s1408_s25 + $0x18] sm:$0xff]  ;;  %s688_s17 = sshll.u32 %s1410_s10, 4  ;;  %s1575_s26 = sld [smem:[#allocation17_spill]]  ;;  %s1469_s17 = int_to_ptr.vmem [resolvable:$true] %s688_s17 }
 0x152   : > { %906 = vmatpush3.bf16.msra.mxu0 %v1036_v27  ;;  %1034 = vset.pattern.permute.xlu0 %v1195_v29  ;;  %v638_v33 = vld [vmem:[%s1408_s25] sm:$0xff]  ;;  %v544_v34 = vunpack.c.l.s8.bf16 %v543_v31  ;;  %v639_v36 = vld [vmem:[%s1408_s25 + $0x8] sm:$0xff]  ;;  %v1039_v37 = vld [vmem:[%s1397_s16 + $0x18] sm:$0xff]   ;;  %v545_v38 = vunpack.c.h.s8.bf16 %v543_v31  ;;  %s868_s25 = sshll.u32 %s1180_s28, 9  ;;  %s1574_s16 = sld [smem:[#allocation14_spill]] }
 0x153   : > { %907 = vmatprep.subr.bf16.mxu0 %v1037_v28  ;;  %654 = vperm.xlu1 %1035, %v640_v32   ;;  %v636_v42 = vld [vmem:[%s1410_s10 + $0x10] sm:$0xff]  ;;  %s1577_s28 = sand.u32 1, %s1156_s22   ;;  %s1070_s9 = scalar_lea.vmem %s1469_s17, 512 }
 0x154   : > { %644 = vperm.xlu0 %1034, %v638_v33   ;;  %913 = vmatprep.mubr.msk.bf16.mxu0 %vm578_vm0, %v544_v34  ;;  %v634_v45 = vld [vmem:[%s1410_s10] sm:$0xff]  ;;  %s1476_s24 = scalar_lea.sflag [#allocation4], %s1577_s28  ;;  %p1071_p4 = scmp.ne.s32.totalorder %s1469_s17, %s1070_s9 }
 0x155   : > { %v637_v49 = vld [vmem:[%s1410_s10 + $0x18] sm:$0xff]  ;;  %s1196_s12 = smov [#allocation5]  }
 0x156   : > { %908 = vmatpush3.bf16.msra.mxu0 %v1037_v28  ;;  %v635_v54 = vld [vmem:[%s1410_s10 + $0x8] sm:$0xff]  ;;  %s1074_s13 = sshll.u32 %s1196_s12, 4  ;;  %s1075_s13 = int_to_ptr.vmem [resolvable:$false] %s1074_s13 }
 0x157   : > { %909 = vmatprep.subr.bf16.mxu0 %v1038_v30  ;;  %659 = vperm.xlu1 %1035, %v641_v35   ;;  %s1576_s6 = smov %s1575_s26  ;;  %s1467_s29 = scalar_lea.hbm %s1575_s26, %s868_s25 }
 0x158   : > { %649 = vperm.xlu0 %1034, %v639_v36   ;;  %p1578_p11 = scmp.ne.s32.totalorder %s1574_s16, 0  ;;  %s1076_s18 = scalar_lea.vmem %s1075_s13, 1024 }
 0x159   : > { %p1077_p10 = scmp.lt.s32.totalorder %s1469_s17, %s1075_s13  ;;  %p1078_p3 = scmp.lt.s32.totalorder %s1076_s18, %s1070_s9 }
 0x15a   : > { %910 = vmatpush3.bf16.msra.mxu0 %v1038_v30  ;;  %p1072_p1 = pnand %p1071_p4, %p1578_p11 }
 0x15b   : > { %911 = vmatprep.subr.bf16.mxu0 %v1039_v37  ;;  %p1079_p13 = por %p1078_p3, %p1077_p10 }
 0x15c   : > { %p1073_p8 = pneg %p1072_p1 }
 0x15e   : > { %912 = vmatpush3.bf16.msra.mxu0 %v1039_v37  ;;  %p1080_p0 = pnand %p1079_p13, %p1073_p8 }
 0x161   : > { %914 = vmatmul.mubr.msk.bf16.vlgmr.msra.gmra.mrb[0].mxu0 %vm578_vm0, %v545_v38 }
 0x1d2   : > { %v655_v39 = vpop.permute.xlu1 %654 }
 0x1d3   : > { %v645_v40 = vpop.permute.xlu0 %644 }
 0x1d6   : > { %v660_v46 = vpop.permute.xlu1 %659 }
 0x1d7   : > { %v650_v50 = vpop.permute.xlu0 %649 }
 0x234   : > { %v915_v41 = vpop.f32.mrb[0].mxu0 }
 0x235   : > { %v664_v43 = vmul.f32 %v915_v41, %v655_v39  ;;  %v619_v44 = vpop.f32.mrb[1].mxu0 }
 0x236   : > { %v662_v47 = vmul.f32 %v645_v40, %v619_v44  ;;  %v916_v48 = vpop.f32.mrb[2].mxu0 }
 0x237   : > { %v668_v51 = vadd.f32 %v664_v43, %v636_v42  ;;  %v665_v52 = vmul.f32 %v916_v48, %v660_v46  ;;  %v622_v53 = vpop.f32.mrb[3].mxu0 }
 0x238   : > { %v666_v55 = vadd.f32 %v662_v47, %v634_v45  ;;  %v663_v56 = vmul.f32 %v650_v50, %v622_v53 }
 0x239   : > { %672 = vst [vmem:[%s1410_s10 + $0x10] sm:$0xff] %v668_v51  ;;  %v669_v57 = vadd.f32 %v665_v52, %v637_v49 }
 0x23a   : > { %670 = vst [vmem:[%s1410_s10] sm:$0xff] %v666_v55  ;;  %v667_v58 = vadd.f32 %v663_v56, %v635_v54 }
 0x23b   : > { %673 = vst [vmem:[%s1410_s10 + $0x18] sm:$0xff] %v669_v57 }
 0x23c   : > { %671 = vst [vmem:[%s1410_s10 + $0x8] sm:$0xff] %v667_v58 }
 0x23d   : > { %1083 = shalt.err (!%p1080_p0)
}
 0x23e   : > { %s1084_s10 = scalar_lea.hbm %s1467_s29, 512  ;;  %s1088_s19 = scalar_lea.hbm %s1576_s6, 1024 }
 0x23f   : > { %p1085_p5 = scmp.ne.s32.totalorder %s1467_s29, %s1084_s10  ;;  %p1089_p12 = scmp.lt.u32.totalorder %s1467_s29, %s1576_s6 }
 0x240   : > { %p1090_p2 = scmp.lt.u32.totalorder %s1088_s19, %s1084_s10  ;;  %p1092_p4 = scmp.lt.u32.totalorder %s1084_s10, %s1467_s29 }
 0x241   : > { %p1086_p6 = pnand %p1085_p5, %p1578_p11 }
 0x242   : > { %p1091_p7 = por %p1090_p2, %p1089_p12 }
 0x243   : > { %p1087_p9 = pneg %p1086_p6 }
 0x244   : > { %p1093_p1 = por %p1092_p4, %p1091_p7 }
 0x246   : > { %p1094_p8 = pnand %p1093_p1, %p1087_p9 }
 0x248   : > { %1097 = shalt.err (!%p1094_p8)
}
 0x249   : > { %s1197_s25 = smov 128   ;;  %s1198_s27 = smov 8  }
 0x24a   : > { %919 = dma.vmem_to_hbm [thread:$0]  (%p1578_p11), %s1469_s17, 512, %s1467_s29, %s1476_s24, %s1197_s25, %s1197_s25, %s1198_s27  }
 0x24b PF: > { %p930_p10 = scmp.ge.s32.totalorder %s1192_s7, 2  ;;  %s703_s30 = sand.u32 1, %s1152_s21  }
 0x24c   : > { %p1579_p3 = scmp.ne.s32.totalorder %s1568_s11, 0  ;;  %s704_s26 = scalar_lea.sflag [#allocation4], %s703_s30 }
 0x24e   : > { %p926_p13 = pnand %p930_p10, %p1579_p3 }
 0x250   : > { %1147 = dma.done.wait (!%p926_p13), %s704_s26, 512  }
 0x251   : > { %1149 = vsyncadd (!%p926_p13), %s704_s26, 4294966784  ;;  %s22_s7 = sadd.s32 1, %s1192_s7   ;;  %s1580_s24 = sld [smem:[#allocation8_spill]] }
 0x252   : > { %p19_p0 = scmp.ge.s32.totalorder %s22_s7, 8   ;;  %s1581_s25 = sld [smem:[#allocation9_spill]] }
 0x253   : > { %s1582_s26 = sld [smem:[#allocation15_spill]]  ;;  %s1583_s27 = sld [smem:[#allocation10_spill]] }
 0x254   : > { %s1584_s28 = sld [smem:[#allocation11_spill]]  ;;  %s1585_s29 = sld [smem:[#allocation12_spill]] }
 0x255   : > { %s1586_s30 = sld [smem:[#allocation13_spill]]  ;;  %s1587_s21 = smov %s1156_s22 }
 0x256   : > { %s1588_s22 = smov %s1160_s23  ;;  %s1589_s23 = smov %s1321_s20 }
 0x257   :  { %21 = sbr.rel (!%p19_p0) target bundleno = 12 (0xc), region = 102 }
 0x25e   :  { %709 = vsyncpa [#allocation3], 1 }
 0x25f   :  { %711 = vsyncpa [#allocation3 + $0x1], 1 }
 0x260   :  { %712 = vsyncpa [#allocation4], 1 }
 0x261   :  { %714 = vsyncpa [#allocation4 + $0x1], 1 }

</bundles_post_ra>
